<compile_context>
chip_gen: v6e
topology: v6e:2x2x1
jax: 0.10.0
libtpu: 0.0.40
codegen_flags: <defaults>
</compile_context>

<pallas_src>
import functools

import jax
import jax.numpy as jnp
import numpy as np
from jax.experimental import pallas as pl
from jax.experimental.pallas import tpu as pltpu


def _label_smoothing_kernel(x_ref, tgt_ref, out_ref, *, smoothing, n_total,
                            tile_n, needs_mask):
    """One row tile -> one (1, 1, 1) partial-sum output block."""
    x = x_ref[...].astype(jnp.float32)           # (tn, C), cast in-register
    tgt = tgt_ref[...]                           # (tn, 1) int32
    tn, C = x.shape
    confidence = 1.0 - smoothing

    # Folded loss (logprobs never materialized):
    #   logprobs = x - m - lse
    #   loss_row = conf*(m + lse - x_t) + sm*(m + lse - mean(x))
    #            = m + lse - conf*x_t - (sm/C)*sum(x)      (conf + sm == 1)
    m = jnp.max(x, axis=-1, keepdims=True)                          # (tn, 1)
    lse = jnp.log(jnp.sum(jnp.exp(x - m), axis=-1, keepdims=True))  # (tn, 1)

    cls_ids = jax.lax.broadcasted_iota(jnp.int32, (tn, C), 1)
    x_t = jnp.sum(jnp.where(cls_ids == tgt, x, 0.0),
                  axis=-1, keepdims=True)                           # (tn, 1)

    per_row = m + lse - confidence * x_t                            # (tn, 1)
    if smoothing != 0.0:
        x_sum = jnp.sum(x, axis=-1, keepdims=True)                  # (tn, 1)
        per_row = per_row - (smoothing / C) * x_sum

    if needs_mask:
        # Ragged tail: zero rows past the real batch size. Must stay AFTER all
        # per-row math so NaN/Inf from stale padded rows is discarded.
        i = pl.program_id(0)
        row_ids = jax.lax.broadcasted_iota(jnp.int32, (tn, 1), 0) + i * tile_n
        per_row = jnp.where(row_ids < n_total, per_row, 0.0)

    out_ref[...] = jnp.sum(per_row).reshape(1, 1, 1)


def _pick_tile_n(N, C, itemsize):
    """Row-tile size: multiple of sublane packing, ~2 MiB f32-equivalent cap."""
    if itemsize >= 4:
        row_mult = 8
    elif itemsize == 2:
        row_mult = 16          # bf16/f16 pack 16 rows per vreg sublane group
    else:
        row_mult = 32
    cap_bytes = 2 << 20        # f32-equivalent working-set cap per tile
    rows_cap = max(row_mult, ((cap_bytes // (C * 4)) // row_mult) * row_mult)
    if N <= rows_cap:
        return N               # whole batch in one step; block == full array dims
    return rows_cap            # tiled; ragged tail handled by in-kernel mask


def label_smoothing_loss(x, target, *, smoothing=0.0, tile_n=None):
    """x: (N, C) logits (any float dtype), target: (N,) int classes -> scalar."""
    N, C = x.shape
    tgt2d = target.astype(jnp.int32).reshape(N, 1)

    if tile_n is None:
        tile_n = _pick_tile_n(N, C, jnp.dtype(x.dtype).itemsize)
    num_tiles = pl.cdiv(N, tile_n)
    needs_mask = (N % tile_n) != 0

    kernel = functools.partial(
        _label_smoothing_kernel, smoothing=float(smoothing), n_total=N,
        tile_n=tile_n, needs_mask=needs_mask)

    partials = pl.pallas_call(
        kernel,
        out_shape=jax.ShapeDtypeStruct((num_tiles, 1, 1), jnp.float32),
        grid_spec=pltpu.PrefetchScalarGridSpec(
            num_scalar_prefetch=0,
            grid=(num_tiles,),
            in_specs=[
                pl.BlockSpec((tile_n, C), lambda i: (i, 0)),   # logits tile
                pl.BlockSpec((tile_n, 1), lambda i: (i, 0)),   # targets tile
            ],
            # One independent partial-sum block per grid step (no resident
            # accumulator) so the grid axis can be sharded across TensorCores.
            out_specs=pl.BlockSpec((1, 1, 1), lambda i: (i, 0, 0)),
        ),
        compiler_params=pltpu.CompilerParams(
            dimension_semantics=("parallel",)),
    )(x, tgt2d)

    return jnp.sum(partials) * (1.0 / N)


def _reference(x, target, smoothing):
    """Pure-JAX mirror of the PyTorch LabelSmoothing.forward."""
    confidence = 1.0 - smoothing
    logprobs = jax.nn.log_softmax(x.astype(jnp.float32), axis=-1)
    nll = -jnp.take_along_axis(
        logprobs, target[:, None].astype(jnp.int32), axis=-1)[:, 0]
    smooth = -jnp.mean(logprobs, axis=-1)
    return jnp.mean(confidence * nll + smoothing * smooth)


if __name__ == "__main__":
    key = jax.random.PRNGKey(0)
    ks = jax.random.split(key, 8)

    # Test 1: f32, whole batch in one grid step, smoothing=0.1.
    N1, C1, sm1 = 16, 128, 0.1
    x1 = jax.random.normal(ks[0], (N1, C1), jnp.float32) * 2.0
    t1 = jax.random.randint(ks[1], (N1,), 0, C1, dtype=jnp.int32)
    got1 = jax.block_until_ready(label_smoothing_loss(x1, t1, smoothing=sm1))
    np.testing.assert_allclose(np.asarray(got1), np.asarray(_reference(x1, t1, sm1)),
                               atol=2e-5, rtol=2e-5)

    # Test 2: bf16 logits fed directly to the kernel, 2 parallel grid steps, pure NLL.
    N2, C2, sm2 = 32, 128, 0.0
    x2 = (jax.random.normal(ks[2], (N2, C2), jnp.float32) * 3.0).astype(jnp.bfloat16)
    t2 = jax.random.randint(ks[3], (N2,), 0, C2, dtype=jnp.int32)
    got2 = jax.block_until_ready(label_smoothing_loss(x2, t2, smoothing=sm2, tile_n=16))
    np.testing.assert_allclose(np.asarray(got2), np.asarray(_reference(x2, t2, sm2)),
                               atol=2e-5, rtol=2e-5)

    # Test 3: batch not a multiple of 8, narrow class dim (block == full array dims).
    N3, C3, sm3 = 10, 32, 0.2
    x3 = jax.random.normal(ks[4], (N3, C3), jnp.float32)
    t3 = jax.random.randint(ks[5], (N3,), 0, C3, dtype=jnp.int32)
    got3 = jax.block_until_ready(label_smoothing_loss(x3, t3, smoothing=sm3))
    np.testing.assert_allclose(np.asarray(got3), np.asarray(_reference(x3, t3, sm3)),
                               atol=2e-5, rtol=2e-5)

    # Test 4: ragged tail (N % tile_n != 0) exercises the in-kernel row mask.
    N4, C4, sm4 = 20, 256, 0.1
    x4 = jax.random.normal(ks[6], (N4, C4), jnp.float32) * 1.5
    t4 = jax.random.randint(ks[7], (N4,), 0, C4, dtype=jnp.int32)
    got4 = jax.block_until_ready(label_smoothing_loss(x4, t4, smoothing=sm4, tile_n=8))
    np.testing.assert_allclose(np.asarray(got4), np.asarray(_reference(x4, t4, sm4)),
                               atol=2e-5, rtol=2e-5)

    print("KERNEL_OK")
</pallas_src>

<mosaic_0001>
module attributes {stable_mosaic.version = 11 : i64} {
  func.func @_label_smoothing_kernel(%arg0: i32, %arg1: memref<16x128xf32, #tpu.memory_space<vmem>>, %arg2: memref<16x1xi32, #tpu.memory_space<vmem>>, %arg3: memref<1x1x1xf32, #tpu.memory_space<vmem>>) attributes {dimension_semantics = [#tpu.dimension_semantics<parallel>], iteration_bounds = array<i64: 1>, scalar_prefetch = 0 : i64, scratch_operands = 0 : i64, tpu.core_type = #tpu.core_type<tc>, window_params = [{transform_indices = @transform_0, window_bounds = array<i64: 16, 128>}, {transform_indices = @transform_1, window_bounds = array<i64: 16, 1>}, {transform_indices = @transform_2, window_bounds = array<i64: 1, 1, 1>}]} {
    %c0 = arith.constant 0 : index
    %c0_0 = arith.constant 0 : index
    %0 = vector.load %arg1[%c0, %c0_0] : memref<16x128xf32, #tpu.memory_space<vmem>>, vector<16x128xf32>
    %c0_1 = arith.constant 0 : index
    %c0_2 = arith.constant 0 : index
    %1 = vector.load %arg2[%c0_1, %c0_2] : memref<16x1xi32, #tpu.memory_space<vmem>>, vector<16x1xi32>
    %cst = arith.constant dense<0xFF800000> : vector<16xf32>
    %2 = vector.multi_reduction <maximumf>, %0, %cst [1] : vector<16x128xf32> to vector<16xf32>
    %3 = vector.shape_cast %2 : vector<16xf32> to vector<16x1xf32>
    %4 = vector.broadcast %3 : vector<16x1xf32> to vector<16x128xf32>
    %5 = arith.subf %0, %4 : vector<16x128xf32>
    %6 = math.exp %5 : vector<16x128xf32>
    %cst_3 = arith.constant dense<0.000000e+00> : vector<16xf32>
    %7 = vector.multi_reduction <add>, %6, %cst_3 [1] : vector<16x128xf32> to vector<16xf32>
    %8 = vector.shape_cast %7 : vector<16xf32> to vector<16x1xf32>
    %9 = math.log %8 : vector<16x1xf32>
    %10 = tpu.iota {dimensions = array<i32: 1>} : vector<16x128xi32>
    %11 = vector.broadcast %1 : vector<16x1xi32> to vector<16x128xi32>
    %12 = arith.cmpi eq, %10, %11 : vector<16x128xi32>
    %cst_4 = arith.constant 0.000000e+00 : f32
    %13 = vector.broadcast %cst_4 : f32 to vector<16x128xf32>
    %14 = arith.select %12, %0, %13 : vector<16x128xi1>, vector<16x128xf32>
    %cst_5 = arith.constant dense<0.000000e+00> : vector<16xf32>
    %15 = vector.multi_reduction <add>, %14, %cst_5 [1] : vector<16x128xf32> to vector<16xf32>
    %16 = vector.shape_cast %15 : vector<16xf32> to vector<16x1xf32>
    %17 = arith.addf %3, %9 : vector<16x1xf32>
    %cst_6 = arith.constant 0.899999976 : f32
    %18 = vector.broadcast %cst_6 : f32 to vector<16x1xf32>
    %19 = arith.mulf %18, %16 : vector<16x1xf32>
    %20 = arith.subf %17, %19 : vector<16x1xf32>
    %cst_7 = arith.constant dense<0.000000e+00> : vector<16xf32>
    %21 = vector.multi_reduction <add>, %0, %cst_7 [1] : vector<16x128xf32> to vector<16xf32>
    %22 = vector.shape_cast %21 : vector<16xf32> to vector<16x1xf32>
    %cst_8 = arith.constant 7.812500e-04 : f32
    %23 = vector.broadcast %cst_8 : f32 to vector<16x1xf32>
    %24 = arith.mulf %23, %22 : vector<16x1xf32>
    %25 = arith.subf %20, %24 : vector<16x1xf32>
    %26 = vector.shape_cast %25 : vector<16x1xf32> to vector<1x16x1xf32>
    %cst_9 = arith.constant dense<0.000000e+00> : vector<1xf32>
    %27 = vector.multi_reduction <add>, %26, %cst_9 [1, 2] : vector<1x16x1xf32> to vector<1xf32>
    %28 = vector.shape_cast %27 : vector<1xf32> to vector<1x1x1xf32>
    %29 = vector.extract %28[0, 0, 0] : f32 from vector<1x1x1xf32>
    %30 = vector.broadcast %29 : f32 to vector<1x1x1xf32>
    %c0_10 = arith.constant 0 : index
    %c0_11 = arith.constant 0 : index
    %c0_12 = arith.constant 0 : index
    %31 = vector.load %arg3[%c0_10, %c0_11, %c0_12] : memref<1x1x1xf32, #tpu.memory_space<vmem>>, vector<1x1x1xf32>
    tpu.vector_store %arg3[%c0_10, %c0_11, %c0_12], %30 {strides = array<i32>} : memref<1x1x1xf32, #tpu.memory_space<vmem>>, vector<1x1x1xf32>,
    return
  }
  func.func @transform_0(%arg0: i32) -> (i32, i32) {
    %c0_i32 = arith.constant 0 : i32
    %c0_i32_0 = arith.constant 0 : i32
    return %arg0, %c0_i32 : i32, i32
  }
  func.func @transform_1(%arg0: i32) -> (i32, i32) {
    %c0_i32 = arith.constant 0 : i32
    %c0_i32_0 = arith.constant 0 : i32
    return %arg0, %c0_i32 : i32, i32
  }
  func.func @transform_2(%arg0: i32) -> (i32, i32, i32) {
    %c0_i32 = arith.constant 0 : i32
    %c0_i32_0 = arith.constant 0 : i32
    %c0_i32_1 = arith.constant 0 : i32
    return %arg0, %c0_i32, %c0_i32_0 : i32, i32, i32
  }
}

</mosaic_0001>

<bundles_post_ra>
// kernel: tpu_custom_call.1
= control target key start
LH: loop header
LB: loop body
LE: loop exit
PB: predicated region body
PF: predicated region fallthrough
CT: control target
= control target key end

     0   :  { %v130_v2 = vmov 0   ;;  %s162_s0 = inlined_call_operand.vmem [shape: f32[16,128], index: 0, kind: input, shape index: {}]   ;;  %s163_s1 = inlined_call_operand.vmem [shape: s32[16,1], index: 1, kind: input, shape index: {}]   ;;  %s164_s2 = inlined_call_operand.hbm [shape: f32[1,1,1], index: 2, kind: output, shape index: {}]  }
   0x1   :  { %v12_v0 = vld [vmem:[%s162_s0] sm:$0xff]  ;;  %98 = vset.pattern.permute.xlu1 %v130_v2 }
   0x2   :  { %v14_v1 = vld [vmem:[%s163_s1] sm:$0xff]  ;;  %16 = vmax.xlane.f32.xlu0 %v12_v0 }
   0x3   :  { %7 = vsyncpa [#allocation3], 0  ;;  %v13_v3 = vld [vmem:[%s162_s0 + $0x8] sm:$0xff]  ;;  %37 = vperm.xlu1 %98, %v14_v1   ;;  %99 = vset.pattern.permute.xlu0 %v130_v2  ;;  %v34_v11 = vlaneseq  ;;  %vm64_vm2 = vcmask 7168   ;;  %s131_s0 = smov [#allocation2]   ;;  %vm78_vm3 = vcmask 0  }
   0x4   :  { %v15_v4 = vld [vmem:[%s163_s1 + $0x8] sm:$0xff]  ;;  %s86_s1 = sshll.u32 %s131_s0, 4  ;;  %s87_s1 = int_to_ptr.vmem [resolvable:$true] %s86_s1 }
   0x5   :  { %v35_v13 = vand.u32 127, %v34_v11  ;;  %s108_s18 = scalar_lea.vmem %s87_s1, 16  ;;  %s112_s19 = scalar_lea.vmem %s87_s1, 32 }
   0x6   :  { %18 = vmax.xlane.f32.xlu0 %v13_v3  ;;  %p109_p0 = scmp.ne.s32.totalorder %s87_s1, %s108_s18  ;;  %p113_p1 = scmp.lt.s32.totalorder %s87_s1, %s87_s1 }
   0x7   :  { %40 = vperm.xlu1 %98, %v15_v4   ;;  %p114_p2 = scmp.lt.s32.totalorder %s112_s19, %s108_s18 }
   0x9   :  { %p115_p3 = por %p114_p2, %p113_p1 }
   0xb   :  { %p116_p4 = pnand %p115_p3, %p109_p0 }
  0x7e   :  { %v38_v12 = vpop.permute.xlu1 %37 }
  0x7f   :  { %vm42_vm0 = vcmp.eq.s32.totalorder %v35_v13, %v38_v12 }
  0x80   :  { %v44_v16 = vsel %vm42_vm0, %v12_v0, 0.0 }
  0x82   :  { %v41_v15 = vpop.permute.xlu1 %40 }
  0x83   :  { %vm43_vm1 = vcmp.eq.s32.totalorder %v35_v13, %v41_v15 }
  0x84   :  { %v45_v18 = vsel %vm43_vm1, %v13_v3, 0.0 }
  0x8b   :  { %v17_v5 = vpop.xlane.xlu0 %16 }
  0x8c   :  { %v20_v6 = vsub.f32 %v12_v0, %v17_v5 }
  0x8e   :  { %v22_v7 = vmul.f32 1.442695, %v20_v6 }
  0x8f   :  { %v19_v8 = vpop.xlane.xlu0 %18 }
  0x90   :  { %100 = vpow2.f32 %v22_v7  ;;  %v21_v9 = vsub.f32 %v13_v3, %v19_v8 }
  0x92   :  { %v24_v10 = vmul.f32 1.442695, %v21_v9 }
  0x94   :  { %102 = vpow2.f32 %v24_v10 }
  0x9d   :  { %v101_v14 = vpop.eup %100 }
  0x9e   :  { %26 = vadd.xlane.f32.xlu0 %v101_v14 }
  0xa1   :  { %v103_v17 = vpop.eup %102 }
  0xa2   :  { %28 = vadd.xlane.f32.xlu1 %v103_v17  ;;  %46 = vadd.xlane.f32.xlu0 %v44_v16 }
  0xa6   :  { %48 = vadd.xlane.f32.xlu0 %v45_v18 }
  0xaa   :  { %56 = vadd.xlane.f32.xlu0 %v12_v0 }
  0xae   :  { %58 = vadd.xlane.f32.xlu0 %v13_v3 }
 0x127   :  { %v27_v19 = vpop.xlane.xlu0 %26 }
 0x128   :  { %104 = vlog2.f32 %v27_v19 }
 0x12b   :  { %v29_v20 = vpop.xlane.xlu1 %28  ;;  %v47_v21 = vpop.xlane.xlu0 %46 }
 0x12c   :  { %106 = vlog2.f32 %v29_v20  ;;  %v52_v27 = vmul.f32 0.9, %v47_v21 }
 0x12f   :  { %v49_v22 = vpop.xlane.xlu0 %48 }
 0x130   :  { %v53_v34 = vmul.f32 0.9, %v49_v22 }
 0x133   :  { %v57_v23 = vpop.xlane.xlu0 %56 }
 0x134   :  { %v60_v32 = vmul.f32 0.00078125, %v57_v23 }
 0x135   :  { %v105_v24 = vpop.eup %104 }
 0x136   :  { %v31_v25 = vmul.f32 0.6931472, %v105_v24 }
 0x137   :  { %v59_v29 = vpop.xlane.xlu0 %58 }
 0x138   :  { %v50_v26 = vadd.f32 %v31_v25, %v17_v5  ;;  %v61_v35 = vmul.f32 0.00078125, %v59_v29 }
 0x139   :  { %v107_v28 = vpop.eup %106 }
 0x13a   :  { %v33_v30 = vmul.f32 0.6931472, %v107_v28  ;;  %v54_v31 = vsub.f32 %v50_v26, %v52_v27 }
 0x13c   :  { %v51_v33 = vadd.f32 %v33_v30, %v19_v8  ;;  %v62_v37 = vsub.f32 %v54_v31, %v60_v32 }
 0x13e   :  { %v55_v36 = vsub.f32 %v51_v33, %v53_v34  ;;  %v65_v39 = vsel %vm64_vm2, %v62_v37, 0.0 }
 0x140   :  { %v63_v38 = vsub.f32 %v55_v36, %v61_v35 }
 0x142   :  { %v66_v40 = vsel %vm64_vm2, %v63_v38, 0.0 }
 0x143   :  { %v67_v41 = vadd.f32 %v66_v40, %v65_v39 }
 0x145   :  { %68 = vadd.xlane.f32.xlu0 %v67_v41 }
 0x1ce   :  { %v69_v42 = vpop.xlane.xlu0 %68 }
 0x1cf   :  { %v70_v43 = vrot.slane %v69_v42, 4 }
 0x1d1   :  { %v71_v44 = vadd.f32 %v70_v43, %v69_v42 }
 0x1d3   :  { %v72_v45 = vrot.slane %v71_v44, 2 }
 0x1d5   :  { %v73_v46 = vadd.f32 %v72_v45, %v71_v44 }
 0x1d7   :  { %v74_v47 = vrot.slane %v73_v46, 1 }
 0x1d9   :  { %v75_v48 = vadd.f32 %v74_v47, %v73_v46 }
 0x1db   :  { %94 = vpush %v75_v48 }
 0x20c   :  { %s95_s17 = spop %94 }
 0x20d   :  { %v77_v49 = vstv %s95_s17 }
 0x20e   :  { %79 = vst.msk [vmem:[#allocation2] sm:$0x1] %vm78_vm3, %v77_v49 }
 0x20f   :  { %119 = shalt.err (!%p116_p4)
}
 0x210   :  { %89 = dma.vmem_to_hbm [thread:$0]  %s87_s1, 16, %s164_s2, [#allocation3]  }
 0x211   :  { %128 = dma.done.wait [#allocation3], 16  }
 0x212   :  { %129 = vsyncadd [#allocation3], 4294967280 }
 0x213   :  { %93 = vsyncpa [#allocation3], 1 }

</bundles_post_ra>
